<compile_context>
chip_gen: v6e
topology: v6e:2x2x1
jax: 0.10.0
libtpu: 0.0.40
codegen_flags: <defaults>
</compile_context>

<pallas_src>
import jax
import jax.numpy as jnp
import numpy as np
from jax.experimental import pallas as pl
from jax.experimental.pallas import tpu as pltpu

_VMEM_LIMIT = 32 * 1024 * 1024  # explicit scoped-VMEM budget (safe on v5e/v6e/v7x)


def _round_up(x, m):
    return (x + m - 1) // m * m


def _pick_rows(m, max_tile=256):
    """Row (second-minor) tiling: tile must be a multiple of 8 (or the full dim)."""
    if m <= 2 * max_tile:
        mp = _round_up(m, 8)
        return mp, mp
    mp = _round_up(m, max_tile)
    return mp, max_tile


def _pick_lane(n, max_tile):
    """Lane (minor) tiling: tile must be a multiple of 128 or equal the full dim."""
    if n <= max_tile:
        return n, n
    for t in range(max_tile, 0, -128):
        if n % t == 0:
            return n, t
    npad = _round_up(n, 128)
    for t in range(max_tile, 0, -128):
        if npad % t == 0:
            return npad, t
    return npad, 128


# ----------------------------------------------------------------------------
# Tiled batched matmul: [G, M, K] x [G, K, N] -> [G, M, N]
# bf16 operands, f32 MXU accumulation in a VMEM scratch.
# ----------------------------------------------------------------------------
def _bmm_kernel(a_ref, b_ref, o_ref, acc_ref):
    @pl.when(pl.program_id(3) == 0)
    def _():
        acc_ref[...] = jnp.zeros_like(acc_ref)

    acc_ref[...] += jnp.dot(a_ref[...], b_ref[...], preferred_element_type=jnp.float32)

    @pl.when(pl.program_id(3) == pl.num_programs(3) - 1)
    def _():
        o_ref[...] = acc_ref[...].astype(o_ref.dtype)


def bmm_pallas(a, b, out_dtype=jnp.float32):
    g, m, k = a.shape
    g2, k2, n = b.shape
    assert g == g2 and k == k2
    a = a.astype(jnp.bfloat16)
    b = b.astype(jnp.bfloat16)

    mp, tm = _pick_rows(m, 256)
    kp, tk = _pick_lane(k, 512)
    npd, tn = _pick_lane(n, 256)
    if mp != m or kp != k:
        a = jnp.pad(a, ((0, 0), (0, mp - m), (0, kp - k)))
    if kp != k or npd != n:
        b = jnp.pad(b, ((0, 0), (0, kp - k), (0, npd - n)))

    out = pl.pallas_call(
        _bmm_kernel,
        out_shape=jax.ShapeDtypeStruct((g, mp, npd), out_dtype),
        grid=(g, mp // tm, npd // tn, kp // tk),
        in_specs=[
            pl.BlockSpec((None, tm, tk), lambda gi, i, j, kk: (gi, i, kk)),
            pl.BlockSpec((None, tk, tn), lambda gi, i, j, kk: (gi, kk, j)),
        ],
        out_specs=pl.BlockSpec((None, tm, tn), lambda gi, i, j, kk: (gi, i, j)),
        scratch_shapes=[pltpu.VMEM((tm, tn), jnp.float32)],
        compiler_params=pltpu.CompilerParams(
            dimension_semantics=("parallel", "parallel", "parallel", "arbitrary"),
            vmem_limit_bytes=_VMEM_LIMIT,
        ),
    )(a, b)
    if mp != m or npd != n:
        out = out[:, :m, :n]
    return out


# ----------------------------------------------------------------------------
# BatchNorm batch statistics: per-channel sum / sum-of-squares reduction.
# Accumulates in (8, C) output blocks (VPU adds per step; no per-step XLU collapse).
# ----------------------------------------------------------------------------
def _bn_stats_kernel(x_ref, s_ref, q_ref):
    @pl.when(pl.program_id(0) == 0)
    def _():
        s_ref[...] = jnp.zeros_like(s_ref)
        q_ref[...] = jnp.zeros_like(q_ref)

    x = x_ref[...]
    x3 = x.reshape(-1, 8, x.shape[-1])
    s_ref[...] += jnp.sum(x3, axis=0)
    q_ref[...] += jnp.sum(x3 * x3, axis=0)


def bn_stats_pallas(x2d):
    """x2d: [R, C] f32 -> (mean, biased var) per channel (PyTorch train-mode BN)."""
    r, c = x2d.shape
    x2d = x2d.astype(jnp.float32)
    rp = _round_up(r, 8)
    tr = min(1024, rp)
    rp = _round_up(rp, tr)
    if rp != r:
        x2d = jnp.pad(x2d, ((0, rp - r), (0, 0)))  # zero rows do not perturb the sums
    s8, q8 = pl.pallas_call(
        _bn_stats_kernel,
        out_shape=(jax.ShapeDtypeStruct((8, c), jnp.float32),
                   jax.ShapeDtypeStruct((8, c), jnp.float32)),
        grid=(rp // tr,),
        in_specs=[pl.BlockSpec((tr, c), lambda i: (i, 0))],
        out_specs=(pl.BlockSpec((8, c), lambda i: (0, 0)),
                   pl.BlockSpec((8, c), lambda i: (0, 0))),
        compiler_params=pltpu.CompilerParams(
            dimension_semantics=("arbitrary",),
            vmem_limit_bytes=_VMEM_LIMIT,
        ),
    )(x2d)
    count = float(r)
    mean = jnp.sum(s8, axis=0) / count
    var = jnp.maximum(jnp.sum(q8, axis=0) / count - mean * mean, 0.0)  # clamp: avoid NaN
    return mean, var


# ----------------------------------------------------------------------------
# Fused BN affine + ReLU (f32 math, bf16 output for the next layer's matmul).
# ----------------------------------------------------------------------------
def _affine_relu_kernel(x_ref, sc_ref, sh_ref, o_ref):
    y = x_ref[...] * sc_ref[...] + sh_ref[...]
    o_ref[...] = jnp.maximum(y, 0.0).astype(o_ref.dtype)


def affine_relu_pallas(x2d, scale, shift, out_dtype=jnp.bfloat16):
    r, c = x2d.shape
    rp = _round_up(r, 8)
    tr = min(512, rp)
    rp = _round_up(rp, tr)
    if rp != r:
        x2d = jnp.pad(x2d, ((0, rp - r), (0, 0)))
    out = pl.pallas_call(
        _affine_relu_kernel,
        out_shape=jax.ShapeDtypeStruct((rp, c), out_dtype),
        grid=(rp // tr,),
        in_specs=[
            pl.BlockSpec((tr, c), lambda i: (i, 0)),
            pl.BlockSpec((1, c), lambda i: (0, 0)),
            pl.BlockSpec((1, c), lambda i: (0, 0)),
        ],
        out_specs=pl.BlockSpec((tr, c), lambda i: (i, 0)),
        compiler_params=pltpu.CompilerParams(
            dimension_semantics=("parallel",),
            vmem_limit_bytes=_VMEM_LIMIT,
        ),
    )(x2d.astype(jnp.float32),
      scale.reshape(1, c).astype(jnp.float32),
      shift.reshape(1, c).astype(jnp.float32))
    if rp != r:
        out = out[:r]
    return out


# ----------------------------------------------------------------------------
# ConvTranspose2d(k=4, s=2, p=1, bias=False) via sub-pixel (parity) decomposition.
# out[n, 2m+ph, 2q+pw, :] = sum_{dh,dw in {0,1}} x_pad[n, m+ph+dh, q+pw+dw, :] @
#                           W[:, :, 3-ph-2dh, 3-pw-2dw]
# ----------------------------------------------------------------------------
def conv_transpose_parity(x_nhwc, w):
    """x: [Nb,H,W,Ci], w: [Ci,Co,4,4] (PyTorch layout).  Returns [4, Nb*H*W, Co] f32,
    parity-major (p = 2*ph + pw)."""
    nb, h, wd, ci = x_nhwc.shape
    x = x_nhwc.astype(jnp.bfloat16)
    xp = jnp.pad(x, ((0, 0), (1, 1), (1, 1), (0, 0)))
    wb = w.astype(jnp.bfloat16)

    a_list, b_list = [], []
    for ph in (0, 1):
        for pw in (0, 1):
            taps = [xp[:, ph + dh:ph + dh + h, pw + dw:pw + dw + wd, :]
                    for dh in (0, 1) for dw in (0, 1)]
            a_list.append(jnp.concatenate(taps, axis=-1).reshape(nb * h * wd, 4 * ci))
            wt = [wb[:, :, 3 - ph - 2 * dh, 3 - pw - 2 * dw]
                  for dh in (0, 1) for dw in (0, 1)]
            b_list.append(jnp.concatenate(wt, axis=0))
    a_all = jnp.stack(a_list, axis=0)   # [4, M, 4*Ci] bf16
    b_all = jnp.stack(b_list, axis=0)   # [4, 4*Ci, Co] bf16
    return bmm_pallas(a_all, b_all)     # [4, M, Co] f32


def _interleave_parity(y4, nb, h, wd, co):
    """parity-major [4*Nb*H*W, Co] (or [4, Nb*H*W, Co]) -> [Nb, 2H, 2W, Co]."""
    y = y4.reshape(2, 2, nb, h, wd, co)
    y = jnp.transpose(y, (2, 3, 0, 4, 1, 5))        # -> [Nb, H, ph, W, pw, Co]
    return y.reshape(nb, 2 * h, 2 * wd, co)         # contiguous merge (free reshape)


# ----------------------------------------------------------------------------
# Final Conv2d(Ci -> 3, k=7, s=1, p=3, bias=False) + Tanh, fused in one Pallas kernel.
# Width taps are pre-expanded (7x) in HBM; height taps are handled by streaming the
# output row-block plus its halo block and accumulating into an f32 scratch.
# ----------------------------------------------------------------------------
def _conv7_kernel_factory(th, wf, cin7, n_delta):
    def kernel(c_ref, b_ref, o_ref, acc_ref):
        d = pl.program_id(2)

        @pl.when(d == 0)
        def _():
            acc_ref[...] = jnp.zeros_like(acc_ref)

        cols = c_ref[...]  # (th, wf, cin7)

        def emit(dd):
            def body():
                for kh in range(7):
                    o_lo = max(0, dd * th - kh)
                    o_hi = min(th, (dd + 1) * th - kh)
                    if o_lo >= o_hi:
                        continue
                    i_lo = o_lo + kh - dd * th
                    i_hi = i_lo + (o_hi - o_lo)
                    lhs = cols[i_lo:i_hi].reshape((o_hi - o_lo) * wf, cin7)
                    part = jnp.dot(lhs, b_ref[kh], preferred_element_type=jnp.float32)
                    acc_ref[o_lo:o_hi] += part.reshape(o_hi - o_lo, wf, 3)
            return body

        for dd in range(n_delta):
            pl.when(d == dd)(emit(dd))

        @pl.when(d == n_delta - 1)
        def _():
            o_ref[...] = jnp.tanh(acc_ref[...]).astype(o_ref.dtype)

    return kernel


def conv7_tanh(x_nhwc, w_final):
    """x: [Nb,Hf,Wf,Ci], w_final: [3,Ci,7,7] -> tanh(conv7(x)): [Nb,Hf,Wf,3] f32."""
    x = x_nhwc.astype(jnp.bfloat16)
    nb, hf, wf, ci = x.shape

    th = 1
    for t in (16, 8, 4, 2, 1):
        if hf % t == 0:
            th = t
            break
    n_delta = 1 + -(-6 // th)                      # blocks needed to cover th+6 rows

    # width-direction im2col (7x), then height padding for block-halo access
    xw = jnp.pad(x, ((0, 0), (0, 0), (3, 3), (0, 0)))
    cols = jnp.concatenate([xw[:, :, kw:kw + wf, :] for kw in range(7)], axis=-1)
    top, bot = 3, (n_delta - 1) * th - 3
    cols = jnp.pad(cols, ((0, 0), (top, bot), (0, 0), (0, 0)))   # [Nb, Hf+(nd-1)*th, Wf, 7Ci]

    b7 = jnp.transpose(w_final, (2, 3, 1, 0)).reshape(7, 7 * ci, 3).astype(jnp.bfloat16)

    kernel = _conv7_kernel_factory(th, wf, 7 * ci, n_delta)
    return pl.pallas_call(
        kernel,
        out_shape=jax.ShapeDtypeStruct((nb, hf, wf, 3), jnp.float32),
        grid=(nb, hf // th, n_delta),
        in_specs=[
            pl.BlockSpec((None, th, wf, 7 * ci), lambda n, h, d: (n, h + d, 0, 0)),
            pl.BlockSpec((7, 7 * ci, 3), lambda n, h, d: (0, 0, 0)),
        ],
        out_specs=pl.BlockSpec((None, th, wf, 3), lambda n, h, d: (n, h, 0, 0)),
        scratch_shapes=[pltpu.VMEM((th, wf, 3), jnp.float32)],
        compiler_params=pltpu.CompilerParams(
            dimension_semantics=("parallel", "parallel", "arbitrary"),
            vmem_limit_bytes=_VMEM_LIMIT,
        ),
    )(cols, b7)


# ----------------------------------------------------------------------------
# Full Decoder_rgb forward
# ----------------------------------------------------------------------------
def decoder_rgb_forward(x_nchw, ct_params, w_final, eps=1e-5):
    x = jnp.transpose(x_nchw, (0, 2, 3, 1)).astype(jnp.bfloat16)    # NHWC, bf16 activations

    for (w, gamma, beta) in ct_params:
        nb, h, wd, ci = x.shape
        co = w.shape[1]
        y4 = conv_transpose_parity(x, w)                            # [4, M, Co] f32
        y2 = y4.reshape(4 * nb * h * wd, co)
        mean, var = bn_stats_pallas(y2)                             # train-mode batch stats
        scale = gamma.astype(jnp.float32) * jax.lax.rsqrt(var + eps)
        shift = beta.astype(jnp.float32) - mean * scale
        a = affine_relu_pallas(y2, scale, shift)                    # fused BN affine + ReLU
        x = _interleave_parity(a, nb, h, wd, co)                    # [Nb, 2H, 2W, Co] bf16

    y = conv7_tanh(x, w_final)                                      # fused 7x7 conv + tanh
    return jnp.transpose(y, (0, 3, 1, 2))                           # -> NCHW


# ----------------------------------------------------------------------------
# Parameter init + self-checks + demo
# ----------------------------------------------------------------------------
def init_params(conv_dims, key):
    params = []
    c = conv_dims
    for _ in range(5):
        key, k1, k2, k3 = jax.random.split(key, 4)
        w = 0.05 * jax.random.normal(k1, (c, c // 2, 4, 4), jnp.float32)
        gamma = 1.0 + 0.1 * jax.random.normal(k2, (c // 2,), jnp.float32)
        beta = 0.1 * jax.random.normal(k3, (c // 2,), jnp.float32)
        params.append((w, gamma, beta))
        c //= 2
    key, kf = jax.random.split(key)
    w_final = 0.05 * jax.random.normal(kf, (3, c, 7, 7), jnp.float32)
    return tuple(params), w_final


def _bf16_round(a):
    return a.astype(jnp.bfloat16).astype(jnp.float32)


def _check_conv_transpose():
    key = jax.random.PRNGKey(7)
    k1, k2 = jax.random.split(key)
    nb, h, wd, ci, co = 1, 3, 2, 3, 2
    x = _bf16_round(jax.random.normal(k1, (nb, h, wd, ci), jnp.float32))
    w = _bf16_round(jax.random.normal(k2, (ci, co, 4, 4), jnp.float32))
    y4 = conv_transpose_parity(x, w)
    got = np.array(_interleave_parity(y4, nb, h, wd, co))
    ref = np.zeros((nb, 2 * h, 2 * wd, co), np.float32)
    xn, wn = np.array(x), np.array(w)
    for b in range(nb):
        for ih in range(h):
            for iw in range(wd):
                for kh in range(4):
                    for kw in range(4):
                        oh, ow = 2 * ih + kh - 1, 2 * iw + kw - 1
                        if 0 <= oh < 2 * h and 0 <= ow < 2 * wd:
                            ref[b, oh, ow, :] += xn[b, ih, iw, :] @ wn[:, :, kh, kw]
    assert np.allclose(got, ref, atol=5e-3, rtol=5e-3), np.abs(got - ref).max()


def _check_bn_stats():
    x = jax.random.normal(jax.random.PRNGKey(3), (300, 8), jnp.float32)
    mean, var = bn_stats_pallas(x)
    assert np.allclose(np.array(mean), np.array(jnp.mean(x, 0)), atol=1e-4)
    assert np.allclose(np.array(var), np.array(jnp.var(x, 0)), atol=1e-4)


def _check_conv7():
    key = jax.random.PRNGKey(11)
    k1, k2 = jax.random.split(key)
    nb, hf, wf, ci = 1, 8, 8, 3
    x = _bf16_round(jax.random.normal(k1, (nb, hf, wf, ci), jnp.float32))
    w = _bf16_round(0.1 * jax.random.normal(k2, (3, ci, 7, 7), jnp.float32))
    got = np.array(conv7_tanh(x, w))
    xn = np.pad(np.array(x), ((0, 0), (3, 3), (3, 3), (0, 0)))
    wn = np.array(w)
    ref = np.zeros((nb, hf, wf, 3), np.float32)
    for kh in range(7):
        for kw in range(7):
            ref += xn[:, kh:kh + hf, kw:kw + wf, :] @ wn[:, :, kh, kw].T
    ref = np.tanh(ref)
    assert np.allclose(got, ref, atol=5e-3, rtol=5e-3), np.abs(got - ref).max()


if __name__ == "__main__":
    _check_conv_transpose()
    _check_bn_stats()
    _check_conv7()

    conv_dims = 64     # scaled-down stand-in for the default 2048
    batch, spatial = 2, 4

    key = jax.random.PRNGKey(0)
    key, kx = jax.random.split(key)
    x = jax.random.normal(kx, (batch, conv_dims, spatial, spatial), jnp.float32)  # NCHW

    ct_params, w_final = init_params(conv_dims, key)

    fwd = jax.jit(decoder_rgb_forward)
    out = jax.block_until_ready(fwd(x, ct_params, w_final))

    assert out.shape == (batch, 3, spatial * 32, spatial * 32), out.shape
    assert bool(jnp.all(jnp.isfinite(out)))
    assert bool(jnp.all(jnp.abs(out) <= 1.0 + 1e-5))  # tanh range
    print("KERNEL_OK")
</pallas_src>

<mosaic_0001>
module attributes {stable_mosaic.version = 11 : i64} {
  func.func @_bmm_kernel(%arg0: i32, %arg1: i32, %arg2: i32, %arg3: i32, %arg4: memref<1x8x12xbf16, #tpu.memory_space<vmem>>, %arg5: memref<1x12x2xbf16, #tpu.memory_space<vmem>>, %arg6: memref<1x8x2xf32, #tpu.memory_space<vmem>>, %arg7: memref<8x2xf32, #tpu.memory_space<vmem>>) attributes {dimension_semantics = [#tpu.dimension_semantics<parallel>, #tpu.dimension_semantics<parallel>, #tpu.dimension_semantics<parallel>, #tpu.dimension_semantics<arbitrary>], iteration_bounds = array<i64: 4, 1, 1, 1>, scalar_prefetch = 0 : i64, scratch_operands = 1 : i64, tpu.core_type = #tpu.core_type<tc>, window_params = [{transform_indices = @transform_0, window_bounds = array<i64: 1, 8, 12>}, {transform_indices = @transform_1, window_bounds = array<i64: 1, 12, 2>}, {transform_indices = @transform_2, window_bounds = array<i64: 1, 8, 2>}]} {
    %c0_i32 = arith.constant 0 : i32
    %0 = arith.cmpi eq, %arg3, %c0_i32 : i32
    %1 = arith.extui %0 : i1 to i32
    %c0_i32_0 = arith.constant 0 : i32
    %2 = arith.cmpi ne, %1, %c0_i32_0 : i32
    scf.if %2 {
      %cst_12 = arith.constant 0.000000e+00 : f32
      %14 = vector.broadcast %cst_12 : f32 to vector<8x2xf32>
      %c0_13 = arith.constant 0 : index
      %c0_14 = arith.constant 0 : index
      %15 = vector.load %arg7[%c0_13, %c0_14] : memref<8x2xf32, #tpu.memory_space<vmem>>, vector<8x2xf32>
      tpu.vector_store %arg7[%c0_13, %c0_14], %14 {strides = array<i32>} : memref<8x2xf32, #tpu.memory_space<vmem>>, vector<8x2xf32>,
    } else {
    }
    %c0 = arith.constant 0 : index
    %c0_1 = arith.constant 0 : index
    %3 = vector.load %arg7[%c0, %c0_1] : memref<8x2xf32, #tpu.memory_space<vmem>>, vector<8x2xf32>
    %c0_2 = arith.constant 0 : index
    %c0_3 = arith.constant 0 : index
    %c0_4 = arith.constant 0 : index
    %4 = vector.load %arg4[%c0_2, %c0_3, %c0_4] : memref<1x8x12xbf16, #tpu.memory_space<vmem>>, vector<1x8x12xbf16>
    %5 = vector.shape_cast %4 : vector<1x8x12xbf16> to vector<8x12xbf16>
    %c0_5 = arith.constant 0 : index
    %c0_6 = arith.constant 0 : index
    %c0_7 = arith.constant 0 : index
    %6 = vector.load %arg5[%c0_5, %c0_6, %c0_7] : memref<1x12x2xbf16, #tpu.memory_space<vmem>>, vector<1x12x2xbf16>
    %7 = vector.shape_cast %6 : vector<1x12x2xbf16> to vector<12x2xbf16>
    %cst = arith.constant dense<0.000000e+00> : vector<8x2xf32>
    %8 = tpu.matmul %5, %7, %cst {dimension_numbers = #tpu.dot_dimension_numbers<[1], [0], [0], [1], [0, 0, 1, 1], [], []>} : vector<8x12xbf16>, vector<12x2xbf16>, vector<8x2xf32> -> vector<8x2xf32>
    %9 = arith.addf %3, %8 : vector<8x2xf32>
    %c0_8 = arith.constant 0 : index
    %c0_9 = arith.constant 0 : index
    %10 = vector.load %arg7[%c0_8, %c0_9] : memref<8x2xf32, #tpu.memory_space<vmem>>, vector<8x2xf32>
    tpu.vector_store %arg7[%c0_8, %c0_9], %9 {strides = array<i32>} : memref<8x2xf32, #tpu.memory_space<vmem>>, vector<8x2xf32>,
    %c0_i32_10 = arith.constant 0 : i32
    %11 = arith.cmpi eq, %arg3, %c0_i32_10 : i32
    %12 = arith.extui %11 : i1 to i32
    %c0_i32_11 = arith.constant 0 : i32
    %13 = arith.cmpi ne, %12, %c0_i32_11 : i32
    scf.if %13 {
      %c0_12 = arith.constant 0 : index
      %c0_13 = arith.constant 0 : index
      %14 = vector.load %arg7[%c0_12, %c0_13] : memref<8x2xf32, #tpu.memory_space<vmem>>, vector<8x2xf32>
      %c0_14 = arith.constant 0 : index
      %c0_15 = arith.constant 0 : index
      %c0_16 = arith.constant 0 : index
      %15 = vector.load %arg6[%c0_14, %c0_15, %c0_16] : memref<1x8x2xf32, #tpu.memory_space<vmem>>, vector<1x8x2xf32>
      %16 = vector.shape_cast %15 : vector<1x8x2xf32> to vector<8x2xf32>
      %17 = vector.shape_cast %14 : vector<8x2xf32> to vector<1x8x2xf32>
      tpu.vector_store %arg6[%c0_14, %c0_15, %c0_16], %17 {strides = array<i32>} : memref<1x8x2xf32, #tpu.memory_space<vmem>>, vector<1x8x2xf32>,
    } else {
    }
    return
  }
  func.func @transform_0(%arg0: i32, %arg1: i32, %arg2: i32, %arg3: i32) -> (i32, i32, i32) {
    %c0_i32 = arith.constant 0 : i32
    return %arg0, %arg1, %arg3 : i32, i32, i32
  }
  func.func @transform_1(%arg0: i32, %arg1: i32, %arg2: i32, %arg3: i32) -> (i32, i32, i32) {
    %c0_i32 = arith.constant 0 : i32
    return %arg0, %arg3, %arg2 : i32, i32, i32
  }
  func.func @transform_2(%arg0: i32, %arg1: i32, %arg2: i32, %arg3: i32) -> (i32, i32, i32) {
    %c0_i32 = arith.constant 0 : i32
    return %arg0, %arg1, %arg2 : i32, i32, i32
  }
}

</mosaic_0001>

<bundles_post_ra>
// kernel: tpu_custom_call.1
= control target key start
LH: loop header
LB: loop body
LE: loop exit
PB: predicated region body
PF: predicated region fallthrough
CT: control target
= control target key end

     0   :  { %s526_s9 = smov 0   ;;  %s528_s10 = smov 0   ;;  %s565_s0 = inlined_call_operand.vmem [shape: bf16[4,8,12], index: 0, kind: input, shape index: {}]   ;;  %s566_s1 = inlined_call_operand.vmem [shape: bf16[4,12,2], index: 1, kind: input, shape index: {}]   ;;  %s567_s2 = inlined_call_operand.vmem [shape: f32[4,8,2], index: 2, kind: output, shape index: {}]  }
   0x1   :  { %s530_s11 = smov 0  }
   0x2 LB: > { %s38_s12 = sadd.s32 1, %s503_s10  ;;  %p440_p0 = scmp.ge.s32.totalorder %s507_s11, 1  ;;  %s507_s11 = sphi %s530_s11, %s12_s11   ;;  %s503_s10 = sphi %s528_s10, %s569_s10   ;;  %s499_s9 = sphi %s526_s9, %s568_s9  }
   0x3   : > { %p40_p1 = scmp.ge.s32.totalorder %s38_s12, 4  ;;  %p173_p2 = scmp.lt.s32.totalorder %s507_s11, 5 }
   0x5   : > { %s571_s12 = smov (%p40_p1, %s38_s12), 0  ;;  %p174_p3 = pnand %p440_p0, %p173_p2 }
   0x6   : > { %p217_p4 = scmp.lt.s32.totalorder (!%p174_p3), %s499_s9, 3 }
   0x7   : > { %177 = sbr.rel (%p174_p3) target bundleno = 224 (0xe0), region = 28 }
   0xc   : > { %vm255_vm0 = vcmask 15360   ;;  %v509_v0 = vmov 0.0   ;;  %vm510_vm1 = vmmov 0   ;;  %s573_s9 = smov (!%p217_p4, %s499_s9), 3  ;;  %vm270_vm2 = vcmask 1045504  }
   0xd   : > { %256 = vst.msk [vmem:[#allocation2] sm:$0xff] %vm255_vm0, %v509_v0  ;;  %452 = vmatprep.subr.bf16.mxu0 %v509_v0  ;;  %454 = vmatprep.mubr.msk.bf16.mxu0 %vm510_vm1, %v509_v0  ;;  %s449_s13 = sshll.u32 %s573_s9, 3  ;;  %s441_s14 = sshll.u32 %s573_s9, 2  ;;  %vm266_vm3 = vcmask 97280  }
   0xe   : > { %s238_s17 = scalar_lea.vmem %s566_s1, %s449_s13  ;;  %s226_s20 = scalar_lea.vmem %s565_s0, %s441_s14 }
   0xf   : > { %v484_v1 = vld [vmem:[%s238_s17] sm:$0x3f]   ;;  %s249_s23 = scalar_lea.vmem %s567_s2, %s449_s13 }
  0x10   : > { %v272_v2 = vsel %vm270_vm2, %v484_v1, 0  ;;  %v258_v3 = vld [vmem:[%s226_s20] sm:$0xf] }
  0x11   : > { %453 = vmatpush3.bf16.msra.mxu0 %v272_v2 }
  0x14   : > { %455 = vmatmul.mubr.msk.bf16.vlgmr.msra.gmra.mxu0 %vm266_vm3, %v258_v3  ;;  %v257_v4 = vld [vmem:[#allocation2] sm:$0xff] }
  0xd4   : > { %v308_v5 = vpop.f32.mrf.mxu0 }
  0xd5   : > { %v314_v6 = vadd.f32 %v308_v5, %v257_v4 }
  0xd6   : > { %v456_v7 = vpop.f32.mrf.mxu0 }
  0xd7   : > { %316 = vst.msk [vmem:[#allocation2] sm:$0xff] %vm255_vm0, %v314_v6 }
  0xd8   : > { %v311_v8 = vpop.f32.mrf.mxu0 }
  0xda   : > { %v457_v9 = vpop.f32.mrf.mxu0 }
  0xde   : > { %v320_v10 = vld [vmem:[#allocation2] sm:$0xff] }
  0xdf   : > { %321 = vst.msk [vmem:[%s249_s23] sm:$0xff] %vm255_vm0, %v320_v10 }
  0xe0 PF: > { %s12_s11 = sadd.s32 1, %s507_s11   ;;  %s568_s9 = smov %s503_s10 }
  0xe1   : > { %p9_p5 = scmp.ge.s32.totalorder %s12_s11, 6   ;;  %s569_s10 = smov %s571_s12 }
  0xe3   :  { %11 = sbr.rel (!%p9_p5) target bundleno = 2 (0x2), region = 69 }

</bundles_post_ra>
